<compile_context>
chip_gen: v5e
topology: v5e:2x2
jax: 0.10.0
libtpu: 0.0.40
codegen_flags: <defaults>
</compile_context>

<pallas_src>
import functools

import numpy as np

import jax
import jax.numpy as jnp
from jax.experimental import pallas as pl
from jax.experimental.pallas import tpu as pltpu

_LANES = 128
_SUBLANES = 8
_SMALL_CHUNK = _LANES * _SUBLANES          # pad unit for the gridless path
_BLOCK_ROWS = 512                          # rows per grid step (large-N path)
_LARGE_CHUNK = _BLOCK_ROWS * _LANES        # pad unit for the gridded path
_RESIDENT_ROWS_MAX = 2048                  # <= 1 MiB resident f32 -> no grid
_NUM_ACC = 4


def mlp_kernel(params_ref, x_ref, o_ref, *, n_pos, n_neg):
    # params_ref: flat f32 SMEM array, layout:
    #   [ a_pos(0..n_pos) | c_pos(0..n_pos) | a_neg(0..n_neg) | c_neg(0..n_neg) | b2 ]
    # x_ref / o_ref: (rows, 128) f32 tiles in VMEM (lane-dense batch of scalars).
    x = x_ref[...]
    hidden = n_pos + n_neg
    n_acc = min(_NUM_ACC, max(hidden, 1))
    accs = [None] * n_acc

    def add_to(slot, v):
        accs[slot] = v if accs[slot] is None else accs[slot] + v

    unit = 0
    # w2 >= 0 units:  w2*relu(x*w1+b1) == max(x*a + c, 0)
    for j in range(n_pos):
        t = x * params_ref[j] + params_ref[n_pos + j]
        add_to(unit % n_acc, jnp.maximum(t, 0.0))
        unit += 1
    # w2 < 0 units:   w2*relu(x*w1+b1) == min(x*a + c, 0)
    base = 2 * n_pos
    for j in range(n_neg):
        t = x * params_ref[base + j] + params_ref[base + n_neg + j]
        add_to(unit % n_acc, jnp.minimum(t, 0.0))
        unit += 1

    live = [a for a in accs if a is not None]
    if live:
        acc = live[0]
        for a in live[1:]:
            acc = acc + a
    else:  # hidden == 0 (degenerate)
        acc = jnp.zeros_like(x)

    b2_off = 2 * n_pos + 2 * n_neg
    o_ref[...] = (acc + params_ref[b2_off]).astype(o_ref.dtype)


def pack_params(w1, b1, w2, b2):
    """Host-side (static) packing: fold layer 2 into layer 1 and partition by
    sign(w2).  Returns (params_flat, n_pos, n_neg)."""
    w1f = np.asarray(w1, dtype=np.float32).reshape(-1)
    b1f = np.asarray(b1, dtype=np.float32).reshape(-1)
    w2f = np.asarray(w2, dtype=np.float32).reshape(-1)
    b2f = np.asarray(b2, dtype=np.float32).reshape(-1)

    a = w1f * w2f
    c = b1f * w2f
    pos = np.where(w2f >= 0.0)[0]   # w2 == 0 units land here and contribute 0
    neg = np.where(w2f < 0.0)[0]

    params_flat = np.concatenate(
        [a[pos], c[pos], a[neg], c[neg], b2f[:1]]).astype(np.float32)
    return jnp.asarray(params_flat), int(pos.size), int(neg.size)


@functools.partial(jax.jit, static_argnames=("n_pos", "n_neg"))
def _net_forward_impl(x, params_flat, *, n_pos, n_neg):
    N = x.shape[0]
    rows_small = pl.cdiv(N, _SMALL_CHUNK) * _SMALL_CHUNK // _LANES
    use_grid = rows_small > _RESIDENT_ROWS_MAX

    chunk = _LARGE_CHUNK if use_grid else _SMALL_CHUNK
    n_pad = pl.cdiv(N, chunk) * chunk
    rows = n_pad // _LANES

    xf = jnp.pad(x.reshape(-1), (0, n_pad - N))
    x2d = xf.reshape(rows, _LANES)

    kernel = functools.partial(mlp_kernel, n_pos=n_pos, n_neg=n_neg)
    smem_spec = pl.BlockSpec(memory_space=pltpu.MemorySpace.SMEM)

    if not use_grid:
        # Tiny / moderate N: one invocation, whole tile resident, no pipeline.
        y2d = pl.pallas_call(
            kernel,
            out_shape=jax.ShapeDtypeStruct(x2d.shape, jnp.float32),
            in_specs=[
                smem_spec,                                            # packed params
                pl.BlockSpec(memory_space=pltpu.MemorySpace.VMEM),    # x (rows,128)
            ],
            out_specs=pl.BlockSpec(memory_space=pltpu.MemorySpace.VMEM),
        )(params_flat, x2d)
    else:
        # Large N: 1-D parallel grid over rows -> HBM pipelining + megacore.
        y2d = pl.pallas_call(
            kernel,
            out_shape=jax.ShapeDtypeStruct(x2d.shape, jnp.float32),
            grid=(rows // _BLOCK_ROWS,),
            in_specs=[
                smem_spec,
                pl.BlockSpec((_BLOCK_ROWS, _LANES), lambda i: (i, 0)),
            ],
            out_specs=pl.BlockSpec((_BLOCK_ROWS, _LANES), lambda i: (i, 0)),
            compiler_params=pltpu.CompilerParams(
                dimension_semantics=("parallel",)),
        )(params_flat, x2d)

    # Undo the lane-dense packing (fused inside the same jit).
    return y2d.reshape(-1)[:N].reshape(N, 1)


def net_forward(x, w1, b1, w2, b2):
    """x: (N, 1) f32; w1: (1, H); b1: (H,); w2: (H, 1); b2: (1,)."""
    params_flat, n_pos, n_neg = pack_params(w1, b1, w2, b2)
    return _net_forward_impl(x, params_flat, n_pos=n_pos, n_neg=n_neg)


def init_params(key, hidden=20):
    # Deterministic init mimicking torch.nn.Linear (uniform in +-1/sqrt(fan_in)).
    k1, k2, k3, k4 = jax.random.split(key, 4)
    bound1 = 1.0 / jnp.sqrt(1.0)            # fan_in = 1
    bound2 = 1.0 / jnp.sqrt(float(hidden))  # fan_in = hidden
    w1 = jax.random.uniform(k1, (1, hidden), jnp.float32, -bound1, bound1)
    b1 = jax.random.uniform(k2, (hidden,), jnp.float32, -bound1, bound1)
    w2 = jax.random.uniform(k3, (hidden, 1), jnp.float32, -bound2, bound2)
    b2 = jax.random.uniform(k4, (1,), jnp.float32, -bound2, bound2)
    return w1, b1, w2, b2


if __name__ == "__main__":
    key = jax.random.PRNGKey(0)
    hidden = 20
    w1, b1, w2, b2 = init_params(key, hidden=hidden)

    # Matches the spec: x = torch.unsqueeze(torch.linspace(-1, 1, 1000), dim=1)
    N = 1000
    x = jnp.linspace(-1.0, 1.0, N, dtype=jnp.float32).reshape(N, 1)

    y = net_forward(x, w1, b1, w2, b2)
    y = jax.block_until_ready(y)

    # Reference check in plain JAX.
    ref = jnp.maximum(x @ w1 + b1[None, :], 0.0) @ w2 + b2[None, :]
    assert y.shape == (N, 1)
    assert jnp.allclose(y, ref, atol=1e-5, rtol=1e-5)
    print("KERNEL_OK")
</pallas_src>

<mosaic_0001>
module attributes {stable_mosaic.version = 11 : i64} {
  func.func @mlp_kernel(%arg0: memref<41xf32, #tpu.memory_space<smem>>, %arg1: memref<8x128xf32, #tpu.memory_space<vmem>>, %arg2: memref<8x128xf32, #tpu.memory_space<vmem>>) attributes {dimension_semantics = [], scalar_prefetch = 0 : i64, scratch_operands = 0 : i64, tpu.core_type = #tpu.core_type<tc>} {
    %c0 = arith.constant 0 : index
    %c0_0 = arith.constant 0 : index
    %0 = vector.load %arg1[%c0, %c0_0] : memref<8x128xf32, #tpu.memory_space<vmem>>, vector<8x128xf32>
    %c0_1 = arith.constant 0 : index
    %1 = memref.load %arg0[%c0_1] : memref<41xf32, #tpu.memory_space<smem>>
    %2 = vector.broadcast %1 : f32 to vector<8x128xf32>
    %3 = arith.mulf %0, %2 : vector<8x128xf32>
    %c11 = arith.constant 11 : index
    %4 = memref.load %arg0[%c11] : memref<41xf32, #tpu.memory_space<smem>>
    %5 = vector.broadcast %4 : f32 to vector<8x128xf32>
    %6 = arith.addf %3, %5 : vector<8x128xf32>
    %cst = arith.constant 0.000000e+00 : f32
    %7 = vector.broadcast %cst : f32 to vector<8x128xf32>
    %8 = arith.maximumf %6, %7 : vector<8x128xf32>
    %c1 = arith.constant 1 : index
    %9 = memref.load %arg0[%c1] : memref<41xf32, #tpu.memory_space<smem>>
    %10 = vector.broadcast %9 : f32 to vector<8x128xf32>
    %11 = arith.mulf %0, %10 : vector<8x128xf32>
    %c12 = arith.constant 12 : index
    %12 = memref.load %arg0[%c12] : memref<41xf32, #tpu.memory_space<smem>>
    %13 = vector.broadcast %12 : f32 to vector<8x128xf32>
    %14 = arith.addf %11, %13 : vector<8x128xf32>
    %cst_2 = arith.constant 0.000000e+00 : f32
    %15 = vector.broadcast %cst_2 : f32 to vector<8x128xf32>
    %16 = arith.maximumf %14, %15 : vector<8x128xf32>
    %c2 = arith.constant 2 : index
    %17 = memref.load %arg0[%c2] : memref<41xf32, #tpu.memory_space<smem>>
    %18 = vector.broadcast %17 : f32 to vector<8x128xf32>
    %19 = arith.mulf %0, %18 : vector<8x128xf32>
    %c13 = arith.constant 13 : index
    %20 = memref.load %arg0[%c13] : memref<41xf32, #tpu.memory_space<smem>>
    %21 = vector.broadcast %20 : f32 to vector<8x128xf32>
    %22 = arith.addf %19, %21 : vector<8x128xf32>
    %cst_3 = arith.constant 0.000000e+00 : f32
    %23 = vector.broadcast %cst_3 : f32 to vector<8x128xf32>
    %24 = arith.maximumf %22, %23 : vector<8x128xf32>
    %c3 = arith.constant 3 : index
    %25 = memref.load %arg0[%c3] : memref<41xf32, #tpu.memory_space<smem>>
    %26 = vector.broadcast %25 : f32 to vector<8x128xf32>
    %27 = arith.mulf %0, %26 : vector<8x128xf32>
    %c14 = arith.constant 14 : index
    %28 = memref.load %arg0[%c14] : memref<41xf32, #tpu.memory_space<smem>>
    %29 = vector.broadcast %28 : f32 to vector<8x128xf32>
    %30 = arith.addf %27, %29 : vector<8x128xf32>
    %cst_4 = arith.constant 0.000000e+00 : f32
    %31 = vector.broadcast %cst_4 : f32 to vector<8x128xf32>
    %32 = arith.maximumf %30, %31 : vector<8x128xf32>
    %c4 = arith.constant 4 : index
    %33 = memref.load %arg0[%c4] : memref<41xf32, #tpu.memory_space<smem>>
    %34 = vector.broadcast %33 : f32 to vector<8x128xf32>
    %35 = arith.mulf %0, %34 : vector<8x128xf32>
    %c15 = arith.constant 15 : index
    %36 = memref.load %arg0[%c15] : memref<41xf32, #tpu.memory_space<smem>>
    %37 = vector.broadcast %36 : f32 to vector<8x128xf32>
    %38 = arith.addf %35, %37 : vector<8x128xf32>
    %cst_5 = arith.constant 0.000000e+00 : f32
    %39 = vector.broadcast %cst_5 : f32 to vector<8x128xf32>
    %40 = arith.maximumf %38, %39 : vector<8x128xf32>
    %41 = arith.addf %8, %40 : vector<8x128xf32>
    %c5 = arith.constant 5 : index
    %42 = memref.load %arg0[%c5] : memref<41xf32, #tpu.memory_space<smem>>
    %43 = vector.broadcast %42 : f32 to vector<8x128xf32>
    %44 = arith.mulf %0, %43 : vector<8x128xf32>
    %c16 = arith.constant 16 : index
    %45 = memref.load %arg0[%c16] : memref<41xf32, #tpu.memory_space<smem>>
    %46 = vector.broadcast %45 : f32 to vector<8x128xf32>
    %47 = arith.addf %44, %46 : vector<8x128xf32>
    %cst_6 = arith.constant 0.000000e+00 : f32
    %48 = vector.broadcast %cst_6 : f32 to vector<8x128xf32>
    %49 = arith.maximumf %47, %48 : vector<8x128xf32>
    %50 = arith.addf %16, %49 : vector<8x128xf32>
    %c6 = arith.constant 6 : index
    %51 = memref.load %arg0[%c6] : memref<41xf32, #tpu.memory_space<smem>>
    %52 = vector.broadcast %51 : f32 to vector<8x128xf32>
    %53 = arith.mulf %0, %52 : vector<8x128xf32>
    %c17 = arith.constant 17 : index
    %54 = memref.load %arg0[%c17] : memref<41xf32, #tpu.memory_space<smem>>
    %55 = vector.broadcast %54 : f32 to vector<8x128xf32>
    %56 = arith.addf %53, %55 : vector<8x128xf32>
    %cst_7 = arith.constant 0.000000e+00 : f32
    %57 = vector.broadcast %cst_7 : f32 to vector<8x128xf32>
    %58 = arith.maximumf %56, %57 : vector<8x128xf32>
    %59 = arith.addf %24, %58 : vector<8x128xf32>
    %c7 = arith.constant 7 : index
    %60 = memref.load %arg0[%c7] : memref<41xf32, #tpu.memory_space<smem>>
    %61 = vector.broadcast %60 : f32 to vector<8x128xf32>
    %62 = arith.mulf %0, %61 : vector<8x128xf32>
    %c18 = arith.constant 18 : index
    %63 = memref.load %arg0[%c18] : memref<41xf32, #tpu.memory_space<smem>>
    %64 = vector.broadcast %63 : f32 to vector<8x128xf32>
    %65 = arith.addf %62, %64 : vector<8x128xf32>
    %cst_8 = arith.constant 0.000000e+00 : f32
    %66 = vector.broadcast %cst_8 : f32 to vector<8x128xf32>
    %67 = arith.maximumf %65, %66 : vector<8x128xf32>
    %68 = arith.addf %32, %67 : vector<8x128xf32>
    %c8 = arith.constant 8 : index
    %69 = memref.load %arg0[%c8] : memref<41xf32, #tpu.memory_space<smem>>
    %70 = vector.broadcast %69 : f32 to vector<8x128xf32>
    %71 = arith.mulf %0, %70 : vector<8x128xf32>
    %c19 = arith.constant 19 : index
    %72 = memref.load %arg0[%c19] : memref<41xf32, #tpu.memory_space<smem>>
    %73 = vector.broadcast %72 : f32 to vector<8x128xf32>
    %74 = arith.addf %71, %73 : vector<8x128xf32>
    %cst_9 = arith.constant 0.000000e+00 : f32
    %75 = vector.broadcast %cst_9 : f32 to vector<8x128xf32>
    %76 = arith.maximumf %74, %75 : vector<8x128xf32>
    %77 = arith.addf %41, %76 : vector<8x128xf32>
    %c9 = arith.constant 9 : index
    %78 = memref.load %arg0[%c9] : memref<41xf32, #tpu.memory_space<smem>>
    %79 = vector.broadcast %78 : f32 to vector<8x128xf32>
    %80 = arith.mulf %0, %79 : vector<8x128xf32>
    %c20 = arith.constant 20 : index
    %81 = memref.load %arg0[%c20] : memref<41xf32, #tpu.memory_space<smem>>
    %82 = vector.broadcast %81 : f32 to vector<8x128xf32>
    %83 = arith.addf %80, %82 : vector<8x128xf32>
    %cst_10 = arith.constant 0.000000e+00 : f32
    %84 = vector.broadcast %cst_10 : f32 to vector<8x128xf32>
    %85 = arith.maximumf %83, %84 : vector<8x128xf32>
    %86 = arith.addf %50, %85 : vector<8x128xf32>
    %c10 = arith.constant 10 : index
    %87 = memref.load %arg0[%c10] : memref<41xf32, #tpu.memory_space<smem>>
    %88 = vector.broadcast %87 : f32 to vector<8x128xf32>
    %89 = arith.mulf %0, %88 : vector<8x128xf32>
    %c21 = arith.constant 21 : index
    %90 = memref.load %arg0[%c21] : memref<41xf32, #tpu.memory_space<smem>>
    %91 = vector.broadcast %90 : f32 to vector<8x128xf32>
    %92 = arith.addf %89, %91 : vector<8x128xf32>
    %cst_11 = arith.constant 0.000000e+00 : f32
    %93 = vector.broadcast %cst_11 : f32 to vector<8x128xf32>
    %94 = arith.maximumf %92, %93 : vector<8x128xf32>
    %95 = arith.addf %59, %94 : vector<8x128xf32>
    %c22 = arith.constant 22 : index
    %96 = memref.load %arg0[%c22] : memref<41xf32, #tpu.memory_space<smem>>
    %97 = vector.broadcast %96 : f32 to vector<8x128xf32>
    %98 = arith.mulf %0, %97 : vector<8x128xf32>
    %c31 = arith.constant 31 : index
    %99 = memref.load %arg0[%c31] : memref<41xf32, #tpu.memory_space<smem>>
    %100 = vector.broadcast %99 : f32 to vector<8x128xf32>
    %101 = arith.addf %98, %100 : vector<8x128xf32>
    %cst_12 = arith.constant 0.000000e+00 : f32
    %102 = vector.broadcast %cst_12 : f32 to vector<8x128xf32>
    %103 = arith.minimumf %101, %102 : vector<8x128xf32>
    %104 = arith.addf %68, %103 : vector<8x128xf32>
    %c23 = arith.constant 23 : index
    %105 = memref.load %arg0[%c23] : memref<41xf32, #tpu.memory_space<smem>>
    %106 = vector.broadcast %105 : f32 to vector<8x128xf32>
    %107 = arith.mulf %0, %106 : vector<8x128xf32>
    %c32 = arith.constant 32 : index
    %108 = memref.load %arg0[%c32] : memref<41xf32, #tpu.memory_space<smem>>
    %109 = vector.broadcast %108 : f32 to vector<8x128xf32>
    %110 = arith.addf %107, %109 : vector<8x128xf32>
    %cst_13 = arith.constant 0.000000e+00 : f32
    %111 = vector.broadcast %cst_13 : f32 to vector<8x128xf32>
    %112 = arith.minimumf %110, %111 : vector<8x128xf32>
    %113 = arith.addf %77, %112 : vector<8x128xf32>
    %c24 = arith.constant 24 : index
    %114 = memref.load %arg0[%c24] : memref<41xf32, #tpu.memory_space<smem>>
    %115 = vector.broadcast %114 : f32 to vector<8x128xf32>
    %116 = arith.mulf %0, %115 : vector<8x128xf32>
    %c33 = arith.constant 33 : index
    %117 = memref.load %arg0[%c33] : memref<41xf32, #tpu.memory_space<smem>>
    %118 = vector.broadcast %117 : f32 to vector<8x128xf32>
    %119 = arith.addf %116, %118 : vector<8x128xf32>
    %cst_14 = arith.constant 0.000000e+00 : f32
    %120 = vector.broadcast %cst_14 : f32 to vector<8x128xf32>
    %121 = arith.minimumf %119, %120 : vector<8x128xf32>
    %122 = arith.addf %86, %121 : vector<8x128xf32>
    %c25 = arith.constant 25 : index
    %123 = memref.load %arg0[%c25] : memref<41xf32, #tpu.memory_space<smem>>
    %124 = vector.broadcast %123 : f32 to vector<8x128xf32>
    %125 = arith.mulf %0, %124 : vector<8x128xf32>
    %c34 = arith.constant 34 : index
    %126 = memref.load %arg0[%c34] : memref<41xf32, #tpu.memory_space<smem>>
    %127 = vector.broadcast %126 : f32 to vector<8x128xf32>
    %128 = arith.addf %125, %127 : vector<8x128xf32>
    %cst_15 = arith.constant 0.000000e+00 : f32
    %129 = vector.broadcast %cst_15 : f32 to vector<8x128xf32>
    %130 = arith.minimumf %128, %129 : vector<8x128xf32>
    %131 = arith.addf %95, %130 : vector<8x128xf32>
    %c26 = arith.constant 26 : index
    %132 = memref.load %arg0[%c26] : memref<41xf32, #tpu.memory_space<smem>>
    %133 = vector.broadcast %132 : f32 to vector<8x128xf32>
    %134 = arith.mulf %0, %133 : vector<8x128xf32>
    %c35 = arith.constant 35 : index
    %135 = memref.load %arg0[%c35] : memref<41xf32, #tpu.memory_space<smem>>
    %136 = vector.broadcast %135 : f32 to vector<8x128xf32>
    %137 = arith.addf %134, %136 : vector<8x128xf32>
    %cst_16 = arith.constant 0.000000e+00 : f32
    %138 = vector.broadcast %cst_16 : f32 to vector<8x128xf32>
    %139 = arith.minimumf %137, %138 : vector<8x128xf32>
    %140 = arith.addf %104, %139 : vector<8x128xf32>
    %c27 = arith.constant 27 : index
    %141 = memref.load %arg0[%c27] : memref<41xf32, #tpu.memory_space<smem>>
    %142 = vector.broadcast %141 : f32 to vector<8x128xf32>
    %143 = arith.mulf %0, %142 : vector<8x128xf32>
    %c36 = arith.constant 36 : index
    %144 = memref.load %arg0[%c36] : memref<41xf32, #tpu.memory_space<smem>>
    %145 = vector.broadcast %144 : f32 to vector<8x128xf32>
    %146 = arith.addf %143, %145 : vector<8x128xf32>
    %cst_17 = arith.constant 0.000000e+00 : f32
    %147 = vector.broadcast %cst_17 : f32 to vector<8x128xf32>
    %148 = arith.minimumf %146, %147 : vector<8x128xf32>
    %149 = arith.addf %113, %148 : vector<8x128xf32>
    %c28 = arith.constant 28 : index
    %150 = memref.load %arg0[%c28] : memref<41xf32, #tpu.memory_space<smem>>
    %151 = vector.broadcast %150 : f32 to vector<8x128xf32>
    %152 = arith.mulf %0, %151 : vector<8x128xf32>
    %c37 = arith.constant 37 : index
    %153 = memref.load %arg0[%c37] : memref<41xf32, #tpu.memory_space<smem>>
    %154 = vector.broadcast %153 : f32 to vector<8x128xf32>
    %155 = arith.addf %152, %154 : vector<8x128xf32>
    %cst_18 = arith.constant 0.000000e+00 : f32
    %156 = vector.broadcast %cst_18 : f32 to vector<8x128xf32>
    %157 = arith.minimumf %155, %156 : vector<8x128xf32>
    %158 = arith.addf %122, %157 : vector<8x128xf32>
    %c29 = arith.constant 29 : index
    %159 = memref.load %arg0[%c29] : memref<41xf32, #tpu.memory_space<smem>>
    %160 = vector.broadcast %159 : f32 to vector<8x128xf32>
    %161 = arith.mulf %0, %160 : vector<8x128xf32>
    %c38 = arith.constant 38 : index
    %162 = memref.load %arg0[%c38] : memref<41xf32, #tpu.memory_space<smem>>
    %163 = vector.broadcast %162 : f32 to vector<8x128xf32>
    %164 = arith.addf %161, %163 : vector<8x128xf32>
    %cst_19 = arith.constant 0.000000e+00 : f32
    %165 = vector.broadcast %cst_19 : f32 to vector<8x128xf32>
    %166 = arith.minimumf %164, %165 : vector<8x128xf32>
    %167 = arith.addf %131, %166 : vector<8x128xf32>
    %c30 = arith.constant 30 : index
    %168 = memref.load %arg0[%c30] : memref<41xf32, #tpu.memory_space<smem>>
    %169 = vector.broadcast %168 : f32 to vector<8x128xf32>
    %170 = arith.mulf %0, %169 : vector<8x128xf32>
    %c39 = arith.constant 39 : index
    %171 = memref.load %arg0[%c39] : memref<41xf32, #tpu.memory_space<smem>>
    %172 = vector.broadcast %171 : f32 to vector<8x128xf32>
    %173 = arith.addf %170, %172 : vector<8x128xf32>
    %cst_20 = arith.constant 0.000000e+00 : f32
    %174 = vector.broadcast %cst_20 : f32 to vector<8x128xf32>
    %175 = arith.minimumf %173, %174 : vector<8x128xf32>
    %176 = arith.addf %140, %175 : vector<8x128xf32>
    %177 = arith.addf %149, %158 : vector<8x128xf32>
    %178 = arith.addf %177, %167 : vector<8x128xf32>
    %179 = arith.addf %178, %176 : vector<8x128xf32>
    %c40 = arith.constant 40 : index
    %180 = memref.load %arg0[%c40] : memref<41xf32, #tpu.memory_space<smem>>
    %181 = vector.broadcast %180 : f32 to vector<8x128xf32>
    %182 = arith.addf %179, %181 : vector<8x128xf32>
    %c0_21 = arith.constant 0 : index
    %c0_22 = arith.constant 0 : index
    %183 = vector.load %arg2[%c0_21, %c0_22] : memref<8x128xf32, #tpu.memory_space<vmem>>, vector<8x128xf32>
    tpu.vector_store %arg2[%c0_21, %c0_22], %182 {strides = array<i32>} : memref<8x128xf32, #tpu.memory_space<vmem>>, vector<8x128xf32>,
    return
  }
}

</mosaic_0001>

<bundles_post_ra>
// kernel: _net_forward_impl.1
= control target key start
LH: loop header
LB: loop body
LE: loop exit
PB: predicated region body
PF: predicated region fallthrough
CT: control target
= control target key end

     0   :  { %7 = vsyncpa [#allocation4], 0  ;;  %s426_s0 = inlined_call_operand.vmem [shape: f32[41], index: 0, kind: input, shape index: {}]   ;;  %s427_s1 = inlined_call_operand.vmem [shape: f32[8,128], index: 1, kind: input, shape index: {}]   ;;  %s428_s2 = inlined_call_operand.hbm [shape: f32[8,128], index: 2, kind: output, shape index: {}]  }
   0x1   :  { %8 = vsyncpa [#allocation3], 0  ;;  %s14_s11 = sshll.u32 %s426_s0, 4  ;;  %s288_s12 = smov [#allocation2]   ;;  %s15_s11 = int_to_ptr.vmem [resolvable:$true] %s14_s11 }
   0x2   :  { %17 = dma.vmem_to_smem %s15_s11, 16, %s288_s12, [#allocation4]  }
   0x3   :  { %284 = dma.done.wait [#allocation4], 16  }
   0x4   :  { %285 = vsyncadd [#allocation4], 4294967280 }
   0x5   :  { %24 = sfence }
   0x6   :  { %s26_s13 = sld [smem:[#allocation2]]  ;;  %v323_v0 = vld [vmem:[%s427_s1] sm:$0xff] }
   0x7   :  { %s206_s14 = sld [smem:[#allocation2 + $0xb]] }
   0x8   :  { %s207_s15 = sld [smem:[#allocation2 + $0x1]] }
   0x9   :  { %s308_s16 = sld [smem:[#allocation2 + $0xc]] }
   0xa   :  { %s310_s17 = sld [smem:[#allocation2 + $0x2]] }
   0xb   :  { %s312_s18 = sld [smem:[#allocation2 + $0xd]] }
   0xc   :  { %s314_s19 = sld [smem:[#allocation2 + $0x3]]  ;;  %v27_v1 = vstv %s26_s13 }
   0xd   :  { %s316_s20 = sld [smem:[#allocation2 + $0xe]]  ;;  %v28_v2 = vmul.f32 %v27_v1, %v323_v0  ;;  %v30_v3 = vstv %s206_s14 }
   0xe   :  { %s213_s0 = sld [smem:[#allocation2 + $0x4]]  ;;  %v34_v5 = vstv %s207_s15 }
   0xf   :  { %s318_s21 = sld [smem:[#allocation2 + $0xf]]  ;;  %v31_v6 = vadd.f32 %v30_v3, %v28_v2  ;;  %v35_v10 = vmul.f32 %v34_v5, %v323_v0  ;;  %v37_v13 = vstv %s308_s16 }
  0x10   :  { %s215_s24 = sld [smem:[#allocation2 + $0x5]]  ;;  %v41_v7 = vstv %s310_s17 }
  0x11   :  { %s325_s25 = sld [smem:[#allocation2 + $0x10]]  ;;  %v32_v16 = vmax.f32 %v31_v6, 0.0  ;;  %v42_v17 = vmul.f32 %v41_v7, %v323_v0  ;;  %v44_v18 = vstv %s312_s18  ;;  %v38_v24 = vadd.f32 %v37_v13, %v35_v10 }
  0x12   :  { %s327_s26 = sld [smem:[#allocation2 + $0x6]]  ;;  %v48_v11 = vstv %s314_s19 }
  0x13   :  { %s330_s27 = sld [smem:[#allocation2 + $0x11]]  ;;  %v49_v20 = vmul.f32 %v48_v11, %v323_v0  ;;  %v51_v25 = vstv %s316_s20  ;;  %v45_v32 = vadd.f32 %v44_v18, %v42_v17  ;;  %v39_v42 = vmax.f32 %v38_v24, 0.0 }
  0x14   :  { %s332_s28 = sld [smem:[#allocation2 + $0x7]]  ;;  %v55_v4 = vstv %s213_s0 }
  0x15   :  { %s334_s1 = sld [smem:[#allocation2 + $0x12]]  ;;  %v56_v8 = vmul.f32 %v55_v4, %v323_v0  ;;  %v58_v12 = vstv %s318_s21  ;;  %v52_v36 = vadd.f32 %v51_v25, %v49_v20  ;;  %v46_v46 = vmax.f32 %v45_v32, 0.0 }
  0x16   :  { %s336_s29 = sld [smem:[#allocation2 + $0x8]]  ;;  %v63_v9 = vstv %s215_s24 }
  0x17   :  { %s338_s30 = sld [smem:[#allocation2 + $0x13]]  ;;  %v64_v19 = vmul.f32 %v63_v9, %v323_v0  ;;  %v59_v21 = vadd.f32 %v58_v12, %v56_v8  ;;  %v66_v22 = vstv %s325_s25  ;;  %v53_v50 = vmax.f32 %v52_v36, 0.0  ;;  %s289_s25 = smov [#allocation5]  }
  0x18   :  { %s342_s3 = sld [smem:[#allocation2 + $0x9]]  ;;  %v71_v14 = vstv %s327_s26  ;;  %s194_s26 = sshll.u32 %s289_s25, 4  ;;  %s195_s26 = int_to_ptr.vmem [resolvable:$true] %s194_s26 }
  0x19   :  { %s347_s4 = sld [smem:[#allocation2 + $0x14]]  ;;  %v72_v26 = vmul.f32 %v71_v14, %v323_v0  ;;  %v74_v28 = vstv %s330_s27  ;;  %v67_v33 = vadd.f32 %v66_v22, %v64_v19  ;;  %v60_v37 = vmax.f32 %v59_v21, 0.0 }
  0x1a   :  { %v79_v15 = vstv %s332_s28  ;;  %s352_s5 = sld [smem:[#allocation2 + $0xa]] }
  0x1b   :  { %s357_s6 = sld [smem:[#allocation2 + $0x15]]  ;;  %v80_v27 = vmul.f32 %v79_v15, %v323_v0  ;;  %v82_v29 = vstv %s334_s1  ;;  %v75_v40 = vadd.f32 %v74_v28, %v72_v26  ;;  %v68_v47 = vmax.f32 %v67_v33, 0.0  ;;  %s196_s1 = sshll.u32 %s428_s2, 4  ;;  %s197_s1 = int_to_ptr.hbm [resolvable:$true] %s196_s1 }
  0x1c   :  { %v87_v23 = vstv %s336_s29  ;;  %s362_s7 = sld [smem:[#allocation2 + $0x16]]  ;;  %v61_v51 = vadd.f32 %v60_v37, %v32_v16 }
  0x1d   :  { %s367_s8 = sld [smem:[#allocation2 + $0x1f]]  ;;  %v88_v30 = vmul.f32 %v87_v23, %v323_v0  ;;  %v90_v34 = vstv %s338_s30  ;;  %v83_v41 = vadd.f32 %v82_v29, %v80_v27  ;;  %v76_v54 = vmax.f32 %v75_v40, 0.0 }
  0x1e   :  { %v95_v31 = vstv %s342_s3  ;;  %s373_s9 = sld [smem:[#allocation2 + $0x17]]  ;;  %v69_v62 = vadd.f32 %v68_v47, %v39_v42 }
  0x1f   :  { %v96_v35 = vmul.f32 %v95_v31, %v323_v0  ;;  %s377_s10 = sld [smem:[#allocation2 + $0x20]]  ;;  %v98_v38 = vstv %s347_s4  ;;  %v91_v43 = vadd.f32 %v90_v34, %v88_v30  ;;  %v84_v55 = vmax.f32 %v83_v41, 0.0 }
  0x20   :  { %v103_v39 = vstv %s352_s5  ;;  %s381_s11 = sld [smem:[#allocation2 + $0x18]]  ;;  %v77_v6 = vadd.f32 %v76_v54, %v46_v46 }
  0x21   :  { %s383_s12 = sld [smem:[#allocation2 + $0x21]]  ;;  %v104_v44 = vmul.f32 %v103_v39, %v323_v0  ;;  %v99_v48 = vadd.f32 %v98_v38, %v96_v35  ;;  %v106_v49 = vstv %s357_s6  ;;  %v92_v58 = vmax.f32 %v91_v43, 0.0 }
  0x22   :  { %v111_v45 = vstv %s362_s7  ;;  %s387_s13 = sld [smem:[#allocation2 + $0x19]]  ;;  %v85_v7 = vadd.f32 %v84_v55, %v53_v50 }
  0x23   :  { %s390_s14 = sld [smem:[#allocation2 + $0x22]]  ;;  %v112_v52 = vmul.f32 %v111_v45, %v323_v0  ;;  %v114_v56 = vstv %s367_s8  ;;  %v107_v59 = vadd.f32 %v106_v49, %v104_v44  ;;  %v100_v63 = vmax.f32 %v99_v48, 0.0 }
  0x24   :  { %v119_v53 = vstv %s373_s9  ;;  %s394_s15 = sld [smem:[#allocation2 + $0x1a]]  ;;  %v93_v10 = vadd.f32 %v92_v58, %v61_v51 }
  0x25   :  { %v120_v57 = vmul.f32 %v119_v53, %v323_v0  ;;  %s398_s16 = sld [smem:[#allocation2 + $0x23]]  ;;  %v122_v60 = vstv %s377_s10  ;;  %v115_v3 = vadd.f32 %v114_v56, %v112_v52  ;;  %v108_v11 = vmax.f32 %v107_v59, 0.0 }
  0x26   :  { %v127_v61 = vstv %s381_s11  ;;  %s402_s17 = sld [smem:[#allocation2 + $0x1b]]  ;;  %v101_v14 = vadd.f32 %v100_v63, %v69_v62 }
  0x27   :  { %v123_v1 = vadd.f32 %v122_v60, %v120_v57  ;;  %v128_v2 = vmul.f32 %v127_v61, %v323_v0  ;;  %s405_s18 = sld [smem:[#allocation2 + $0x24]]  ;;  %v130_v4 = vstv %s383_s12  ;;  %v116_v18 = vmin.f32 %v115_v3, 0.0 }
  0x28   :  { %v135_v5 = vstv %s387_s13  ;;  %s239_s19 = sld [smem:[#allocation2 + $0x1c]]  ;;  %v109_v24 = vadd.f32 %v108_v11, %v77_v6 }
  0x29   :  { %v131_v8 = vadd.f32 %v130_v4, %v128_v2  ;;  %v136_v9 = vmul.f32 %v135_v5, %v323_v0  ;;  %s410_s20 = sld [smem:[#allocation2 + $0x25]]  ;;  %v138_v12 = vstv %s390_s14  ;;  %v124_v15 = vmin.f32 %v123_v1, 0.0 }
  0x2a   :  { %v143_v13 = vstv %s394_s15  ;;  %s241_s0 = sld [smem:[#allocation2 + $0x1d]]  ;;  %v117_v31 = vadd.f32 %v116_v18, %v85_v7 }
  0x2b   :  { %v139_v16 = vadd.f32 %v138_v12, %v136_v9  ;;  %v144_v17 = vmul.f32 %v143_v13, %v323_v0  ;;  %s242_s21 = sld [smem:[#allocation2 + $0x26]]  ;;  %v132_v19 = vmin.f32 %v131_v8, 0.0  ;;  %v146_v20 = vstv %s398_s16 }
  0x2c   :  { %v151_v21 = vstv %s402_s17  ;;  %s243_s22 = sld [smem:[#allocation2 + $0x1e]]  ;;  %v125_v28 = vadd.f32 %v124_v15, %v93_v10 }
  0x2d   :  { %v147_v22 = vadd.f32 %v146_v20, %v144_v17  ;;  %v152_v23 = vmul.f32 %v151_v21, %v323_v0  ;;  %s244_s23 = sld [smem:[#allocation2 + $0x27]]  ;;  %v140_v25 = vmin.f32 %v139_v16, 0.0  ;;  %v154_v26 = vstv %s405_s18 }
  0x2e   :  { %v159_v27 = vstv %s239_s19  ;;  %v133_v32 = vadd.f32 %v132_v19, %v101_v14  ;;  %s245_s24 = sld [smem:[#allocation2 + $0x28]] }
  0x2f   :  { %v155_v29 = vadd.f32 %v154_v26, %v152_v23  ;;  %v160_v30 = vmul.f32 %v159_v27, %v323_v0  ;;  %v162_v33 = vstv %s410_s20  ;;  %v148_v35 = vmin.f32 %v147_v22, 0.0 }
  0x30   :  { %v167_v34 = vstv %s241_s0  ;;  %v141_v39 = vadd.f32 %v140_v25, %v109_v24 }
  0x31   :  { %v156_v36 = vmin.f32 %v155_v29, 0.0  ;;  %v163_v37 = vadd.f32 %v162_v33, %v160_v30  ;;  %v168_v38 = vmul.f32 %v167_v34, %v323_v0  ;;  %v170_v40 = vstv %s242_s21 }
  0x32   :  { %v175_v41 = vstv %s243_s22  ;;  %v149_v47 = vadd.f32 %v148_v35, %v117_v31 }
  0x33   :  { %v157_v42 = vadd.f32 %v156_v36, %v125_v28  ;;  %v164_v43 = vmin.f32 %v163_v37, 0.0  ;;  %v171_v44 = vadd.f32 %v170_v40, %v168_v38  ;;  %v176_v45 = vmul.f32 %v175_v41, %v323_v0 }
  0x34   :  { %v178_v46 = vstv %s244_s23  ;;  %v186_v56 = vstv %s245_s24 }
  0x35   :  { %v165_v48 = vadd.f32 %v164_v43, %v133_v32  ;;  %v172_v49 = vmin.f32 %v171_v44, 0.0  ;;  %v179_v50 = vadd.f32 %v178_v46, %v176_v45 }
  0x37   :  { %v173_v51 = vadd.f32 %v172_v49, %v141_v39  ;;  %v180_v52 = vmin.f32 %v179_v50, 0.0  ;;  %v182_v53 = vadd.f32 %v165_v48, %v157_v42 }
  0x39   :  { %v181_v54 = vadd.f32 %v180_v52, %v149_v47  ;;  %v183_v55 = vadd.f32 %v182_v53, %v173_v51 }
  0x3b   :  { %v184_v57 = vadd.f32 %v183_v55, %v181_v54 }
  0x3d   :  { %v187_v58 = vadd.f32 %v186_v56, %v184_v57 }
  0x3f   :  { %188 = vst [vmem:[#allocation5] sm:$0xff] %v187_v58 }
  0x40   :  { %199 = dma.vmem_to_hbm [thread:$0]  %s195_s26, 128, %s197_s1, [#allocation3]  }
  0x41   :  { %286 = dma.done.wait [#allocation3], 128  }
  0x42   :  { %287 = vsyncadd [#allocation3], 4294967168 }
  0x43   :  { %204 = vsyncpa [#allocation3], 1 }
  0x44   :  { %205 = vsyncpa [#allocation4], 1 }

</bundles_post_ra>
